<compile_context>
chip_gen: v7x
topology: tpu7x:2x2x1
jax: 0.10.0
libtpu: 0.0.40
codegen_flags: <defaults>
</compile_context>

<pallas_src>
import functools

import jax
import jax.numpy as jnp
from jax.experimental import pallas as pl
from jax.experimental.pallas import tpu as pltpu


def _amrr_kernel(x_ref, wqkv_ref, bqkv_ref, o_ref, *, tb, seq, d_out):
    """One grid step: self-attention for TB batch elements.

    x_ref    : (TB, S, D_in)   compute dtype (bf16 recommended)
    wqkv_ref : (D_in, 3*D_out) fused [Wq*scale | Wk | Wv], compute dtype
    bqkv_ref : (1, 3*D_out)    fused [bq*scale | bk | bv], f32
    o_ref    : (TB, S, D_out)  output dtype
    """
    cdt = x_ref.dtype

    # Fused QKV projection: one wide MXU matmul over all TB*S rows.
    # (leading-dim collapse only -> no cross-lane relayout)
    xf = x_ref[...].reshape(tb * seq, x_ref.shape[-1])
    qkv = jnp.dot(xf, wqkv_ref[...], preferred_element_type=jnp.float32)
    qkv = qkv + bqkv_ref[...]                       # f32 bias broadcast

    # 1/sqrt(D_out) is pre-folded into Wq/bq wrapper-side -> no scale here.
    q = qkv[:, :d_out].astype(cdt).reshape(tb, seq, d_out)
    k = qkv[:, d_out:2 * d_out].astype(cdt).reshape(tb, seq, d_out)
    v = qkv[:, 2 * d_out:].astype(cdt).reshape(tb, seq, d_out)

    # Batched QK^T contracting the feature dim of both operands directly
    # (no explicit transpose of K), f32 accumulation on the MXU.
    scores = jnp.einsum('bqd,bkd->bqk', q, k, preferred_element_type=jnp.float32)

    # Numerically stable softmax in f32; divide on the EUP (approx reciprocal).
    m = jnp.max(scores, axis=-1, keepdims=True)
    e = jnp.exp(scores - m)
    denom = jnp.sum(e, axis=-1, keepdims=True)
    attn = e * pl.reciprocal(denom, approx=True)

    # attn @ V with compute-dtype operands, f32 accumulation.
    out = jnp.einsum('bqk,bkd->bqd', attn.astype(cdt), v,
                     preferred_element_type=jnp.float32)

    o_ref[...] = out.astype(o_ref.dtype)
    # TODO(synk): for long sequences replace the full (S, S) score matrix with a
    # flash-style KV-tiled online softmax (mandatory on v7x's 64 MiB VMEM).


def _default_tb(B, S, D_in, D_out, c_itemsize):
    """Batch tile: M-dim of the QKV matmul >= ~256 rows, capped by a VMEM budget."""
    tb = max(1, 256 // max(S, 1))
    # Rough per-batch-element VMEM footprint of the kernel body (bytes):
    #   x tile, qkv(f32), q/k/v(cdt), scores+exp(f32), out(f32)
    per_b = (S * D_in * c_itemsize
             + S * 3 * D_out * 4
             + 3 * S * D_out * c_itemsize
             + 2 * S * S * 4
             + S * D_out * 4)
    budget = 24 * 1024 * 1024          # leave headroom under the 64 MiB limit
    cap = max(1, budget // max(per_b, 1))
    return int(max(1, min(tb, cap, B)))


def auxiliary_modal_redundancy_reduction(x, wq, bq, wk, bk, wv, bv, *,
                                         tb=None, compute_dtype=None):
    """x: (B, S, D_in) or (B, D_in). Returns (B, S, D_out) in x.dtype."""
    if x.ndim == 2:
        x = x[:, None, :]                           # matches PyTorch unsqueeze(1)
    B, S, D_in = x.shape
    D_out = wq.shape[1]
    out_dtype = x.dtype
    cdt = compute_dtype if compute_dtype is not None else x.dtype
    c_itemsize = jnp.dtype(cdt).itemsize

    # Fold the attention scale into the Q projection parameters (done once,
    # wrapper-side, on the tiny weight tensors -> free in the kernel).
    scale = 1.0 / float(D_out) ** 0.5
    wq_s = wq * scale
    bq_s = bq * scale

    # Fused QKV parameters (one MXU weight stream instead of three).
    wqkv = jnp.concatenate([wq_s, wk, wv], axis=1).astype(cdt)    # (D_in, 3*D_out)
    bqkv = jnp.concatenate([bq_s, bk, bv], axis=0).reshape(1, 3 * D_out)
    bqkv = bqkv.astype(jnp.float32)

    # Batch tile: pack several batch elements per grid step so the projection
    # matmul sees ~256 rows and per-step pipeline overhead amortises.
    if tb is None:
        tb = _default_tb(B, S, D_in, D_out, c_itemsize)
    tb = int(max(1, min(tb, B)))
    n_tiles = int(pl.cdiv(B, tb))
    B_pad = n_tiles * tb

    xc = x.astype(cdt)
    if B_pad != B:
        xc = jnp.pad(xc, ((0, B_pad - B), (0, 0), (0, 0)))

    kernel = functools.partial(_amrr_kernel, tb=tb, seq=S, d_out=D_out)

    flops = 2 * B_pad * S * D_in * 3 * D_out + 4 * B_pad * S * S * D_out
    transcendentals = B_pad * S * S + B_pad * S          # exp + reciprocal
    bytes_accessed = (xc.size * xc.dtype.itemsize
                      + wqkv.size * wqkv.dtype.itemsize
                      + bqkv.size * bqkv.dtype.itemsize
                      + B_pad * S * D_out * jnp.dtype(out_dtype).itemsize)

    out = pl.pallas_call(
        kernel,
        out_shape=jax.ShapeDtypeStruct((B_pad, S, D_out), out_dtype),
        grid_spec=pltpu.PrefetchScalarGridSpec(
            num_scalar_prefetch=0,
            grid=(n_tiles,),
            in_specs=[
                pl.BlockSpec((tb, S, D_in), lambda b: (b, 0, 0)),     # x tile
                pl.BlockSpec((D_in, 3 * D_out), lambda b: (0, 0)),    # fused W (resident)
                pl.BlockSpec((1, 3 * D_out), lambda b: (0, 0)),       # fused b (resident)
            ],
            out_specs=pl.BlockSpec((tb, S, D_out), lambda b: (b, 0, 0)),
        ),
        compiler_params=pltpu.CompilerParams(
            dimension_semantics=("parallel",),      # megacore-shardable on v7x
            vmem_limit_bytes=64 * 1024 * 1024,
        ),
        cost_estimate=pl.CostEstimate(
            flops=int(flops),
            transcendentals=int(transcendentals),
            bytes_accessed=int(bytes_accessed),
        ),
    )(xc, wqkv, bqkv)

    return out[:B]


def _reference(x, wq, bq, wk, bk, wv, bv):
    if x.ndim == 2:
        x = x[:, None, :]
    q = x @ wq + bq
    k = x @ wk + bk
    v = x @ wv + bv
    scores = jax.nn.softmax(
        (q @ jnp.swapaxes(k, -1, -2)) / jnp.sqrt(q.shape[-1] * 1.0), axis=-1)
    return scores @ v


if __name__ == "__main__":
    key = jax.random.PRNGKey(0)
    B, S, D_in, D_out = 2, 8, 32, 32

    kx, kq, kbq, kk, kbk, kv, kbv, kx2 = jax.random.split(key, 8)
    x = jax.random.normal(kx, (B, S, D_in), dtype=jnp.float32)

    bound = 1.0 / float(D_in) ** 0.5
    wq = jax.random.uniform(kq, (D_in, D_out), minval=-bound, maxval=bound, dtype=jnp.float32)
    bq = jax.random.uniform(kbq, (D_out,), minval=-bound, maxval=bound, dtype=jnp.float32)
    wk = jax.random.uniform(kk, (D_in, D_out), minval=-bound, maxval=bound, dtype=jnp.float32)
    bk = jax.random.uniform(kbk, (D_out,), minval=-bound, maxval=bound, dtype=jnp.float32)
    wv = jax.random.uniform(kv, (D_in, D_out), minval=-bound, maxval=bound, dtype=jnp.float32)
    bv = jax.random.uniform(kbv, (D_out,), minval=-bound, maxval=bound, dtype=jnp.float32)

    ref = _reference(x, wq, bq, wk, bk, wv, bv)

    # 1) f32 compute path (tight check; only deviation is the approx reciprocal).
    out_f32 = jax.block_until_ready(
        auxiliary_modal_redundancy_reduction(
            x, wq, bq, wk, bk, wv, bv, compute_dtype=jnp.float32))
    assert out_f32.shape == (B, S, D_out)
    assert jnp.allclose(out_f32, ref, atol=5e-3, rtol=5e-3)

    # 2) bf16 MXU-operand path (perf-recommended; f32 accumulation + f32 softmax).
    out_bf16 = jax.block_until_ready(
        auxiliary_modal_redundancy_reduction(
            x, wq, bq, wk, bk, wv, bv, compute_dtype=jnp.bfloat16))
    assert out_bf16.shape == (B, S, D_out)
    assert jnp.allclose(out_bf16, ref, atol=5e-2, rtol=5e-2)

    # 3) multi-step grid with batch padding (B not a multiple of the batch tile).
    x5 = jax.random.normal(kx2, (5, S, D_in), dtype=jnp.float32)
    ref5 = _reference(x5, wq, bq, wk, bk, wv, bv)
    out5 = jax.block_until_ready(
        auxiliary_modal_redundancy_reduction(
            x5, wq, bq, wk, bk, wv, bv, tb=2, compute_dtype=jnp.float32))
    assert out5.shape == (5, S, D_out)
    assert jnp.allclose(out5, ref5, atol=5e-3, rtol=5e-3)

    # 4) 2-D input path (PyTorch's unsqueeze(1) branch).
    x2d = x[:, 0, :]
    ref2d = _reference(x2d, wq, bq, wk, bk, wv, bv)
    out2d = jax.block_until_ready(
        auxiliary_modal_redundancy_reduction(
            x2d, wq, bq, wk, bk, wv, bv, compute_dtype=jnp.float32))
    assert out2d.shape == (B, 1, D_out)
    assert jnp.allclose(out2d, ref2d, atol=5e-3, rtol=5e-3)

    print("KERNEL_OK")
</pallas_src>

<mosaic_0001>
module attributes {stable_mosaic.version = 11 : i64} {
  func.func @_amrr_kernel(%arg0: i32, %arg1: memref<2x8x32xf32, #tpu.memory_space<vmem>>, %arg2: memref<32x96xf32, #tpu.memory_space<vmem>>, %arg3: memref<1x96xf32, #tpu.memory_space<vmem>>, %arg4: memref<2x8x32xf32, #tpu.memory_space<vmem>>) attributes {dimension_semantics = [#tpu.dimension_semantics<parallel>], iteration_bounds = array<i64: 1>, scalar_prefetch = 0 : i64, scratch_operands = 0 : i64, tpu.core_type = #tpu.core_type<tc>, window_params = [{transform_indices = @transform_0, window_bounds = array<i64: 2, 8, 32>}, {pipeline_mode = #tpu.pipeline_mode<synchronous>, transform_indices = @transform_1, window_bounds = array<i64: 32, 96>}, {pipeline_mode = #tpu.pipeline_mode<synchronous>, transform_indices = @transform_2, window_bounds = array<i64: 1, 96>}, {transform_indices = @transform_3, window_bounds = array<i64: 2, 8, 32>}]} {
    %c0 = arith.constant 0 : index
    %c0_0 = arith.constant 0 : index
    %c0_1 = arith.constant 0 : index
    %0 = vector.load %arg1[%c0, %c0_0, %c0_1] : memref<2x8x32xf32, #tpu.memory_space<vmem>>, vector<2x8x32xf32>
    %1 = vector.shape_cast %0 : vector<2x8x32xf32> to vector<16x32xf32>
    %c0_2 = arith.constant 0 : index
    %c0_3 = arith.constant 0 : index
    %2 = vector.load %arg2[%c0_2, %c0_3] : memref<32x96xf32, #tpu.memory_space<vmem>>, vector<32x96xf32>
    %cst = arith.constant dense<0.000000e+00> : vector<16x96xf32>
    %3 = tpu.matmul %1, %2, %cst {dimension_numbers = #tpu.dot_dimension_numbers<[1], [0], [0], [1], [0, 0, 1, 1], [], []>} : vector<16x32xf32>, vector<32x96xf32>, vector<16x96xf32> -> vector<16x96xf32>
    %c0_4 = arith.constant 0 : index
    %c0_5 = arith.constant 0 : index
    %4 = vector.load %arg3[%c0_4, %c0_5] : memref<1x96xf32, #tpu.memory_space<vmem>>, vector<1x96xf32>
    %5 = vector.broadcast %4 : vector<1x96xf32> to vector<16x96xf32>
    %6 = arith.addf %3, %5 : vector<16x96xf32>
    %7 = vector.extract_strided_slice %6 {offsets = [0, 0], sizes = [16, 32], strides = [1, 1]} : vector<16x96xf32> to vector<16x32xf32>
    %8 = vector.shape_cast %7 : vector<16x32xf32> to vector<2x8x32xf32>
    %9 = vector.extract_strided_slice %6 {offsets = [0, 32], sizes = [16, 32], strides = [1, 1]} : vector<16x96xf32> to vector<16x32xf32>
    %10 = vector.shape_cast %9 : vector<16x32xf32> to vector<2x8x32xf32>
    %11 = vector.extract_strided_slice %6 {offsets = [0, 64], sizes = [16, 32], strides = [1, 1]} : vector<16x96xf32> to vector<16x32xf32>
    %12 = vector.shape_cast %11 : vector<16x32xf32> to vector<2x8x32xf32>
    "tpu.trace_start"() <{level = 10 : i32, message = "bqd,bkd->bqk"}> : () -> ()
    %cst_6 = arith.constant dense<0.000000e+00> : vector<2x8x8xf32>
    %13 = tpu.matmul %8, %10, %cst_6 {dimension_numbers = #tpu.dot_dimension_numbers<[2], [2], [1], [1], [0, 0, 0, 1, 1, 1], [0], [0]>} : vector<2x8x32xf32>, vector<2x8x32xf32>, vector<2x8x8xf32> -> vector<2x8x8xf32>
    "tpu.trace_stop"() : () -> ()
    %cst_7 = arith.constant dense<0xFF800000> : vector<2x8xf32>
    %14 = vector.multi_reduction <maximumf>, %13, %cst_7 [2] : vector<2x8x8xf32> to vector<2x8xf32>
    %15 = vector.shape_cast %14 : vector<2x8xf32> to vector<2x8x1xf32>
    %16 = vector.broadcast %15 : vector<2x8x1xf32> to vector<2x8x8xf32>
    %17 = arith.subf %13, %16 : vector<2x8x8xf32>
    %18 = math.exp %17 : vector<2x8x8xf32>
    %cst_8 = arith.constant dense<0.000000e+00> : vector<2x8xf32>
    %19 = vector.multi_reduction <add>, %18, %cst_8 [2] : vector<2x8x8xf32> to vector<2x8xf32>
    %20 = vector.shape_cast %19 : vector<2x8xf32> to vector<2x8x1xf32>
    %21 = tpu.reciprocal %20 {approx = true} : vector<2x8x1xf32> -> vector<2x8x1xf32>
    %22 = vector.broadcast %21 : vector<2x8x1xf32> to vector<2x8x8xf32>
    %23 = arith.mulf %18, %22 : vector<2x8x8xf32>
    "tpu.trace_start"() <{level = 10 : i32, message = "bqk,bkd->bqd"}> : () -> ()
    %cst_9 = arith.constant dense<0.000000e+00> : vector<2x8x32xf32>
    %24 = tpu.matmul %23, %12, %cst_9 {dimension_numbers = #tpu.dot_dimension_numbers<[2], [1], [1], [2], [0, 0, 0, 1, 1, 2], [0], [0]>} : vector<2x8x8xf32>, vector<2x8x32xf32>, vector<2x8x32xf32> -> vector<2x8x32xf32>
    "tpu.trace_stop"() : () -> ()
    %c0_10 = arith.constant 0 : index
    %c0_11 = arith.constant 0 : index
    %c0_12 = arith.constant 0 : index
    %25 = vector.load %arg4[%c0_10, %c0_11, %c0_12] : memref<2x8x32xf32, #tpu.memory_space<vmem>>, vector<2x8x32xf32>
    tpu.vector_store %arg4[%c0_10, %c0_11, %c0_12], %24 {strides = array<i32>} : memref<2x8x32xf32, #tpu.memory_space<vmem>>, vector<2x8x32xf32>,
    return
  }
  func.func @transform_0(%arg0: i32) -> (i32, i32, i32) {
    %c0_i32 = arith.constant 0 : i32
    %c0_i32_0 = arith.constant 0 : i32
    %c0_i32_1 = arith.constant 0 : i32
    return %arg0, %c0_i32, %c0_i32_0 : i32, i32, i32
  }
  func.func @transform_1(%arg0: i32) -> (i32, i32) {
    %c0_i32 = arith.constant 0 : i32
    %c0_i32_0 = arith.constant 0 : i32
    %c0_i32_1 = arith.constant 0 : i32
    return %c0_i32, %c0_i32_0 : i32, i32
  }
  func.func @transform_2(%arg0: i32) -> (i32, i32) {
    %c0_i32 = arith.constant 0 : i32
    %c0_i32_0 = arith.constant 0 : i32
    %c0_i32_1 = arith.constant 0 : i32
    return %c0_i32, %c0_i32_0 : i32, i32
  }
  func.func @transform_3(%arg0: i32) -> (i32, i32, i32) {
    %c0_i32 = arith.constant 0 : i32
    %c0_i32_0 = arith.constant 0 : i32
    %c0_i32_1 = arith.constant 0 : i32
    return %arg0, %c0_i32, %c0_i32_0 : i32, i32, i32
  }
}

</mosaic_0001>

<bundles_post_ra>
// kernel: tpu_custom_call.1
= control target key start
LH: loop header
LB: loop body
LE: loop exit
PB: predicated region body
PF: predicated region fallthrough
CT: control target
= control target key end

     0   :  { %8 = vsyncpa [#allocation3], 0  ;;  %s784_s0 = inlined_call_operand.hbm [shape: f32[2,8,32], index: 0, kind: input, shape index: {}]   ;;  %s785_s1 = inlined_call_operand.hbm [shape: f32[32,96], index: 1, kind: input, shape index: {}]   ;;  %s786_s2 = inlined_call_operand.hbm [shape: f32[1,96], index: 2, kind: input, shape index: {}]   ;;  %s787_s3 = inlined_call_operand.hbm [shape: f32[2,8,32], index: 3, kind: output, shape index: {}]  }
   0x1   :  { %9 = vsyncpa [#allocation6], 0 }
   0x2   :  { %10 = vsyncpa [#allocation4], 0  ;;  %s672_s12 = smov [#allocation5]   ;;  %s673_s14 = smov [#allocation2]  }
   0x3   :  { %s28_s13 = sshll.u32 %s672_s12, 4  ;;  %s16_s15 = sshll.u32 %s673_s14, 4  ;;  %s29_s13 = int_to_ptr.vmem [resolvable:$true] %s28_s13  ;;  %s702_s15 = int_to_ptr.vmem [resolvable:$true] %s16_s15 }
   0x4   :  { %s578_s18 = scalar_lea.hbm %s785_s1, 512 }
   0x5   :  { %p579_p0 = scmp.ne.s32.totalorder %s785_s1, %s578_s18  ;;  %p582_p1 = scmp.lt.u32.totalorder %s578_s18, %s785_s1 }
   0x7   :  { %p584_p2 = pnand %p582_p1, %p579_p0 }
   0x9   :  { %587 = shalt.err (!%p584_p2)
}
   0xa   :  { %s588_s23 = scalar_lea.vmem %s29_s13, 512  ;;  %p593_p4 = scmp.lt.s32.totalorder %s29_s13, %s29_s13 }
   0xb   :  { %p589_p3 = scmp.ne.s32.totalorder %s29_s13, %s588_s23  ;;  %p594_p5 = scmp.lt.s32.totalorder %s588_s23, %s588_s23 }
   0xd   :  { %p595_p6 = por %p594_p5, %p593_p4 }
   0xf   :  { %p596_p7 = pnand %p595_p6, %p589_p3 }
  0x11   :  { %599 = shalt.err (!%p596_p7)
}
  0x12   :  { %s674_s24 = smov 128   ;;  %s675_s25 = smov 8  }
  0x13   :  { %34 = dma.hbm_to_vmem [thread:$0]  %s785_s1, 512, %s29_s13, [#allocation6], %s674_s24, %s674_s24, %s675_s25  }
  0x14   :  { %s600_s30 = scalar_lea.hbm %s784_s0, 256 }
  0x15   :  { %p601_p8 = scmp.ne.s32.totalorder %s784_s0, %s600_s30  ;;  %p604_p9 = scmp.lt.u32.totalorder %s600_s30, %s784_s0 }
  0x17   :  { %p606_p10 = pnand %p604_p9, %p601_p8 }
  0x19   :  { %609 = shalt.err (!%p606_p10)
}
  0x1a   :  { %s610_s8 = scalar_lea.vmem %s702_s15, 256  ;;  %p615_p12 = scmp.lt.s32.totalorder %s702_s15, %s702_s15 }
  0x1b   :  { %p611_p11 = scmp.ne.s32.totalorder %s702_s15, %s610_s8  ;;  %p616_p13 = scmp.lt.s32.totalorder %s610_s8, %s610_s8 }
  0x1d   :  { %p617_p0 = por %p616_p13, %p615_p12 }
  0x1f   :  { %p618_p1 = pnand %p617_p0, %p611_p11 }
  0x21   :  { %621 = shalt.err (!%p618_p1)
}
  0x22   :  { %22 = dma.hbm_to_vmem [thread:$0]  %s784_s0, 256, %s702_s15, [#allocation3], %s674_s24, %s674_s24, %s675_s25  }
  0x23   :  { %s676_s10 = smov [#allocation7]   ;;  %s622_s14 = scalar_lea.hbm %s786_s2, 16 }
  0x24   :  { %s41_s11 = sshll.u32 %s676_s10, 4  ;;  %p623_p2 = scmp.ne.s32.totalorder %s786_s2, %s622_s14  ;;  %s42_s11 = int_to_ptr.vmem [resolvable:$true] %s41_s11 }
  0x25   :  { %p626_p3 = scmp.lt.u32.totalorder %s622_s14, %s786_s2 }
  0x27   :  { %p628_p4 = pnand %p626_p3, %p623_p2 }
  0x29   :  { %631 = shalt.err (!%p628_p4)
}
  0x2a   :  { %s632_s20 = scalar_lea.vmem %s42_s11, 16  ;;  %s636_s0 = scalar_lea.vmem %s42_s11, 32 }
  0x2b   :  { %p633_p5 = scmp.ne.s32.totalorder %s42_s11, %s632_s20  ;;  %p637_p6 = scmp.lt.s32.totalorder %s42_s11, %s42_s11 }
  0x2c   :  { %p638_p7 = scmp.lt.s32.totalorder %s636_s0, %s632_s20 }
  0x2e   :  { %p639_p8 = por %p638_p7, %p637_p6 }
  0x30   :  { %p640_p9 = pnand %p639_p8, %p633_p5 }
  0x32   :  { %643 = shalt.err (!%p640_p9)
}
  0x33   :  { %44 = dma.hbm_to_vmem [thread:$0]  %s786_s2, 16, %s42_s11, [#allocation6]  }
  0x34   :  { %666 = dma.done.wait [#allocation3], 256  }
  0x35   :  { %667 = vsyncadd [#allocation3], 4294967040 }
  0x36   :  { %668 = dma.done.wait [#allocation6], 528  }
  0x37   :  { %669 = vsyncadd [#allocation6], 4294966768  ;;  %vm67_vm0 = vcmask 261120   ;;  %v56_v0 = vld [vmem:[#allocation5] sm:$0xff]  ;;  %v57_v1 = vld [vmem:[#allocation5 + $0x8] sm:$0xff]  ;;  %v677_v8 = vmov 0.0  }
  0x38   :  { %v58_v2 = vld [vmem:[#allocation5 + $0x10] sm:$0xff]  ;;  %v552_v3 = vpack.c.bf16 %v57_v1, %v56_v0  ;;  %v59_v4 = vld [vmem:[#allocation5 + $0x18] sm:$0xff]  ;;  %532 = vmatprep.subr.mxu1 %v677_v8  ;;  %vm678_vm1 = vmmov 0   ;;  %v498_v9 = vld [vmem:[#allocation7] ss:$0 sm:$0xff]  ;;  %s679_s2 = smov 96  }
  0x39   :  { %v54_v5 = vld [vmem:[#allocation2] sm:$0xff]  ;;  %v556_v6 = vpack.c.bf16 %v59_v4, %v58_v2  ;;  %v55_v7 = vld [vmem:[#allocation2 + $0x8] sm:$0xff]  ;;  %534 = vmatprep.mubr.msk.f32.mxu1 %vm678_vm1, %v677_v8  ;;  %vm303_vm2 = vcmask 64512   ;;  %s680_s22 = smov 64   ;;  %s681_s23 = smov [#allocation8]  }
  0x3a   :  { %529 = vmatprep.mubr.msk.f32.mxu0 %vm67_vm0, %v54_v5  ;;  %553 = vmatprep.subr.bf16.mxu0 %v552_v3  ;;  %s485_s26 = sshll.u32 %s681_s23, 4  ;;  %s486_s26 = int_to_ptr.vmem [resolvable:$true] %s485_s26 }
  0x3b   :  { %555 = vmatpush3.bf16.msra.mxu0 %v552_v3  ;;  %s644_s27 = scalar_lea.vmem %s486_s26, 256  ;;  %p649_p11 = scmp.lt.s32.totalorder %s486_s26, %s486_s26 }
  0x3c   :  { %557 = vmatprep.subr.bf16.mxu0 %v556_v6  ;;  %p645_p10 = scmp.ne.s32.totalorder %s486_s26, %s644_s27  ;;  %p650_p12 = scmp.lt.s32.totalorder %s644_s27, %s644_s27 }
  0x3e   :  { %p651_p13 = por %p650_p12, %p649_p11 }
  0x3f   :  { %559 = vmatpush3.bf16.msra.mxu0 %v556_v6 }
  0x40   :  { %542 = vmatprep.subr.mxu0 %v677_v8  ;;  %p652_p0 = pnand %p651_p13, %p645_p10 }
  0x42   :  { %530 = vmatmul.mubr.msk.f32.vlgmr.msra.gmra.mrb[0].mxu0 %vm67_vm0, %v55_v7 }
  0x43   :  { %544 = vmatprep.mubr.msk.f32.mxu0 %vm678_vm1, %v677_v8 }
 0x115   :  { %v531_v10 = vpop.f32.mrb[0].mxu0 }
 0x116   :  { %v140_v11 = vpop.f32.mrb[1].mxu0  ;;  %v146_v13 = vadd.f32 %v531_v10, %v498_v9 }
 0x117   :  { %v141_v12 = vadd.f32 %v498_v9, %v140_v11 }
 0x119   :  { %150 = vrot.lane.b32.xlu0 %v141_v12, %s679_s2 }
 0x11d   :  { %227 = vrot.lane.b32.xlu0 %v146_v13, %s679_s2 }
 0x18b   :  { %v151_v14 = vpop.permute.xlu0 %150 }
 0x18c   :  { %533 = vmatpush3.xpose.msk.msra.mxu1 %vm67_vm0, %v151_v14 }
 0x18d   :  { %537 = vmatprep.subr.mxu1 %v677_v8 }
 0x18f   :  { %535 = vmatmul.mubr.msk.f32.vlgmr.msra.gmra.mrb[0].mxu1 %vm67_vm0, %v141_v12  ;;  %v228_v15 = vpop.permute.xlu0 %227 }
 0x190   :  { %538 = vmatpush3.xpose.msk.msra.mxu1 %vm67_vm0, %v228_v15  ;;  %539 = vmatprep.mubr.msk.f32.mxu1 %vm678_vm1, %v677_v8 }
 0x191   :  { %547 = vmatprep.subr.mxu1 %v677_v8 }
 0x193   :  { %540 = vmatmul.mubr.msk.f32.vlgmr.msra.gmra.mrb[2].mxu1 %vm67_vm0, %v146_v13 }
 0x194   :  { %549 = vmatprep.mubr.msk.f32.mxu1 %vm678_vm1, %v677_v8 }
 0x262   :  { %v222_v16 = vpop.f32.mrb[0].mxu1 }
 0x263   :  { %v536_v17 = vpop.f32.mrb[1].mxu1  ;;  %v304_v18 = vsel %vm303_vm2, %v222_v16, -inf }
 0x264   :  { %305 = vmax.xlane.f32.xlu1 %v304_v18 }
 0x266   :  { %v299_v19 = vpop.f32.mrb[2].mxu1 }
 0x267   :  { %v541_v20 = vpop.f32.mrb[3].mxu1  ;;  %v307_v21 = vsel %vm303_vm2, %v299_v19, -inf }
 0x268   :  { %308 = vmax.xlane.f32.xlu1 %v307_v21 }
 0x279   :  { %326 = vrot.lane.b32.xlu1 %v141_v12, %s680_s22 }
 0x2f1   :  { %v306_v22 = vpop.xlane.xlu1 %305 }
 0x2f2   :  { %v310_v23 = vsub.f32 %v222_v16, %v306_v22 }
 0x2f4   :  { %v312_v24 = vmul.f32 1.442695, %v310_v23 }
 0x2f5   :  { %v309_v25 = vpop.xlane.xlu1 %308 }
 0x2f6   :  { %570 = vpow2.f32 %v312_v24  ;;  %v311_v26 = vsub.f32 %v299_v19, %v309_v25 }
 0x2f8   :  { %v314_v27 = vmul.f32 1.442695, %v311_v26 }
 0x2f9   :  { %v327_v28 = vpop.permute.xlu1 %326 }
 0x2fa   :  { %572 = vpow2.f32 %v314_v27  ;;  %543 = vmatpush3.msra.mxu0 %v327_v28 }
 0x300   :  { %v571_v29 = vpop.eup %570 }
 0x301   :  { %v316_v30 = vsel %vm303_vm2, %v571_v29, 0.0 }
 0x302   :  { %317 = vadd.xlane.f32.xlu0 %v316_v30 }
 0x304   :  { %v573_v31 = vpop.eup %572 }
 0x305   :  { %v319_v32 = vsel %vm303_vm2, %v573_v31, 0.0 }
 0x306   :  { %320 = vadd.xlane.f32.xlu1 %v319_v32 }
 0x317   :  { %402 = vrot.lane.b32.xlu1 %v146_v13, %s680_s22 }
 0x38f   :  { %v318_v33 = vpop.xlane.xlu0 %317 }
 0x390   :  { %574 = vrcp.f32 %v318_v33 }
 0x393   :  { %v321_v34 = vpop.xlane.xlu1 %320 }
 0x394   :  { %576 = vrcp.f32 %v321_v34 }
 0x397   :  { %v403_v35 = vpop.permute.xlu1 %402 }
 0x398   :  { %548 = vmatpush3.msra.mxu1 %v403_v35 }
 0x39a   :  { %v575_v36 = vpop.eup %574 }
 0x39b   :  { %v324_v37 = vmul.f32 %v575_v36, %v571_v29 }
 0x39d   :  { %545 = vmatmul.mubr.msk.f32.vlgmr.msra.gmra.mrb[2].mxu0 %vm303_vm2, %v324_v37 }
 0x39e   :  { %v577_v38 = vpop.eup %576 }
 0x39f   :  { %v325_v39 = vmul.f32 %v577_v38, %v573_v31 }
 0x3a1   :  { %550 = vmatmul.mubr.msk.f32.vlgmr.msra.gmra.mrb[4].mxu1 %vm303_vm2, %v325_v39 }
 0x470   :  { %v398_v40 = vpop.f32.mrb[2].mxu0 }
 0x471   :  { %478 = vst.msk [vmem:[#allocation8] sm:$0xff] %vm67_vm0, %v398_v40  ;;  %v546_v41 = vpop.f32.mrb[3].mxu0 }
 0x474   :  { %v474_v42 = vpop.f32.mrb[4].mxu1 }
 0x475   :  { %479 = vst.msk [vmem:[#allocation8 + $0x8] sm:$0xff] %vm67_vm0, %v474_v42  ;;  %v551_v43 = vpop.f32.mrb[5].mxu1 }
 0x476   :  { %655 = shalt.err (!%p652_p0)
}
 0x477   :  { %s656_s30 = scalar_lea.hbm %s787_s3, 256 }
 0x478   :  { %p657_p1 = scmp.ne.s32.totalorder %s787_s3, %s656_s30  ;;  %p660_p2 = scmp.lt.u32.totalorder %s656_s30, %s787_s3 }
 0x47a   :  { %p662_p3 = pnand %p660_p2, %p657_p1 }
 0x47c   :  { %665 = shalt.err (!%p662_p3)
}
 0x47d   :  { %491 = dma.vmem_to_hbm [thread:$0]  %s486_s26, 256, %s787_s3, [#allocation4], %s674_s24, %s674_s24, %s675_s25  }
 0x47e   :  { %670 = dma.done.wait [#allocation4], 256  }
 0x47f   :  { %671 = vsyncadd [#allocation4], 4294967040 }
 0x480   :  { %495 = vsyncpa [#allocation3], 1 }
 0x481   :  { %496 = vsyncpa [#allocation6], 1 }
 0x482   :  { %497 = vsyncpa [#allocation4], 1 }

</bundles_post_ra>
